<compile_context>
chip_gen: v6e
topology: v6e:2x2x1
jax: 0.10.0
libtpu: 0.0.40
codegen_flags: <defaults>
</compile_context>

<pallas_src>
import functools

import jax
import jax.numpy as jnp
from jax.experimental import pallas as pl
from jax.experimental.pallas import tpu as pltpu


def _residual_bottleneck_kernel(
    x_ref,    # (Cin,  HW)      one image: channels on sublanes, pixels on lanes
    w1_ref,   # (Cmid, Cin)     conv1 1x1 weight, BN1 scale folded in
    t1_ref,   # (Cmid, 1)       conv1 bias + BN1 shift folded
    dwm_ref,  # (9, Cmid, HW)   depthwise taps * BN2 scale * boundary mask
    t2_ref,   # (Cmid, 1)       depthwise bias + BN2 shift folded
    w2_ref,   # (Cout, Cmid)    conv2 1x1 weight, BN3 scale folded in
    t3_ref,   # (Cout, 1)       conv2 bias + BN3 shift folded
    o_ref,    # (Cout, HW)
    *, H, W,
):
    HW = H * W

    # ---- conv1 (1x1) + BN + ReLU:  (Cmid,Cin) @ (Cin,HW) on the MXU ----
    h = jnp.dot(w1_ref[...], x_ref[...], preferred_element_type=jnp.float32)
    h = jnp.maximum(h + t1_ref[...], 0.0)

    # ---- depthwise 3x3 (stride 1, pad 1) + BN + ReLU ----
    # Pixels are flattened on the lane axis; each tap is an XLU lane-roll of
    # the activation followed by ONE multiply with the host-precomputed
    # (per-channel tap x per-pixel boundary mask) slab.  Everything stays in
    # registers; no padded scratch, no iota/select.
    acc = h * dwm_ref[4]                      # center tap (mask == 1 everywhere)
    for di in (-1, 0, 1):
        for dj in (-1, 0, 1):
            if di == 0 and dj == 0:
                continue
            k = (di + 1) * 3 + (dj + 1)
            d = di * W + dj                   # flattened-pixel offset of this tap
            shifted = pltpu.roll(h, shift=(-d) % HW, axis=1)
            acc = acc + shifted * dwm_ref[k]
    a = jnp.maximum(acc + t2_ref[...], 0.0)

    # ---- conv2 (1x1) + BN (relu=False -> no ReLU, no residual add) ----
    out = jnp.dot(w2_ref[...], a, preferred_element_type=jnp.float32)
    o_ref[...] = out + t3_ref[...]


def residual_bottleneck(x_nchw, params):
    (w1, b1, g1, be1, m1, v1,
     dw, db, g2, be2, m2, v2,
     w2, b2, g3, be3, m3, v3) = params
    eps = 1e-5

    def fold(g, be, m, v):
        s = g / jnp.sqrt(v + eps)
        t = be - m * s
        return s, t

    s1, t1 = fold(g1, be1, m1, v1)
    s2, t2 = fold(g2, be2, m2, v2)
    s3, t3 = fold(g3, be3, m3, v3)

    N, Cin, H, W = x_nchw.shape
    Cmid = w1.shape[1]
    Cout = w2.shape[1]
    HW = H * W

    # Fold conv biases + BN scales/shifts into the weights (one-time, host).
    w1f = (w1 * s1[None, :]).T.astype(jnp.float32)            # (Cmid, Cin)
    t1f = (b1 * s1 + t1).reshape(Cmid, 1).astype(jnp.float32)
    dwf = (dw * s2[None, :]).T.astype(jnp.float32)            # (Cmid, 9)
    t2f = (db * s2 + t2).reshape(Cmid, 1).astype(jnp.float32)
    w2f = (w2 * s3[None, :]).T.astype(jnp.float32)            # (Cout, Cmid)
    t3f = (b2 * s3 + t3).reshape(Cout, 1).astype(jnp.float32)

    # Precompute the 9 per-tap (per-channel tap * per-pixel boundary mask)
    # slabs on the host: (9, Cmid, HW).  Grid-invariant -> DMA'd once.
    pix = jnp.arange(HW, dtype=jnp.int32)
    row = pix // W
    col = pix % W
    tap_masks = []
    for di in (-1, 0, 1):
        for dj in (-1, 0, 1):
            m = jnp.ones((HW,), jnp.bool_)
            if di == -1:
                m = m & (row >= 1)
            if di == 1:
                m = m & (row <= H - 2)
            if dj == -1:
                m = m & (col >= 1)
            if dj == 1:
                m = m & (col <= W - 2)
            tap_masks.append(m)
    masks = jnp.stack(tap_masks).astype(jnp.float32)          # (9, HW)
    dw_maskw = (dwf.T[:, :, None] * masks[:, None, :]).astype(jnp.float32)  # (9, Cmid, HW)

    # NCHW -> (N, Cin, H*W) is a free reshape (no transpose / extra HBM pass).
    x3 = x_nchw.reshape(N, Cin, HW).astype(jnp.float32)

    kernel = functools.partial(_residual_bottleneck_kernel, H=H, W=W)

    out = pl.pallas_call(
        kernel,
        out_shape=jax.ShapeDtypeStruct((N, Cout, HW), jnp.float32),
        grid=(N,),
        in_specs=[
            pl.BlockSpec((None, Cin, HW), lambda n: (n, 0, 0)),
            pl.BlockSpec((Cmid, Cin), lambda n: (0, 0)),
            pl.BlockSpec((Cmid, 1), lambda n: (0, 0)),
            pl.BlockSpec((9, Cmid, HW), lambda n: (0, 0, 0)),
            pl.BlockSpec((Cmid, 1), lambda n: (0, 0)),
            pl.BlockSpec((Cout, Cmid), lambda n: (0, 0)),
            pl.BlockSpec((Cout, 1), lambda n: (0, 0)),
        ],
        out_specs=pl.BlockSpec((None, Cout, HW), lambda n: (n, 0, 0)),
        compiler_params=pltpu.CompilerParams(
            dimension_semantics=("parallel",)),
    )(x3, w1f, t1f, dw_maskw, t2f, w2f, t3f)

    return out.reshape(N, Cout, H, W)


def reference_forward(x_nchw, params):
    """Pure-JAX reference (same semantics as the PyTorch forward, eval-mode BN)."""
    (w1, b1, g1, be1, m1, v1,
     dw, db, g2, be2, m2, v2,
     w2, b2, g3, be3, m3, v3) = params
    eps = 1e-5
    x = jnp.transpose(x_nchw, (0, 2, 3, 1))
    N, H, W, Cin = x.shape
    Cmid = w1.shape[1]

    def bn(y, g, be, m, v):
        return (y - m) / jnp.sqrt(v + eps) * g + be

    h = jnp.einsum('nhwc,cd->nhwd', x, w1) + b1
    h = jnp.maximum(bn(h, g1, be1, m1, v1), 0.0)

    hp = jnp.pad(h, ((0, 0), (1, 1), (1, 1), (0, 0)))
    dw3 = dw.reshape(3, 3, Cmid)
    acc = jnp.zeros_like(h)
    for i in range(3):
        for j in range(3):
            acc = acc + hp[:, i:i + H, j:j + W, :] * dw3[i, j]
    acc = acc + db
    acc = jnp.maximum(bn(acc, g2, be2, m2, v2), 0.0)

    out = jnp.einsum('nhwd,de->nhwe', acc, w2) + b2
    out = bn(out, g3, be3, m3, v3)
    return jnp.transpose(out, (0, 3, 1, 2))


if __name__ == "__main__":
    key = jax.random.PRNGKey(0)
    ks = jax.random.split(key, 20)
    N, Cin, H, W = 2, 4, 16, 16
    temp = 3
    Cout = 4
    Cmid = Cin * temp

    x = jax.random.normal(ks[0], (N, Cin, H, W), jnp.float32)

    def rnd(k, shape, scale=0.1):
        return scale * jax.random.normal(k, shape, jnp.float32)

    params = (
        # conv1 1x1 weight (Cin, Cmid) [torch (Cmid,Cin,1,1) transposed], bias
        rnd(ks[1], (Cin, Cmid)), rnd(ks[2], (Cmid,)),
        # bn1: gamma, beta, running_mean, running_var
        1.0 + rnd(ks[3], (Cmid,)), rnd(ks[4], (Cmid,)),
        rnd(ks[5], (Cmid,)), 1.0 + jnp.abs(rnd(ks[6], (Cmid,))),
        # depthwise 3x3 weight flattened to (9, Cmid) [torch (Cmid,1,3,3)], bias
        rnd(ks[7], (9, Cmid)), rnd(ks[8], (Cmid,)),
        # bn after depthwise
        1.0 + rnd(ks[9], (Cmid,)), rnd(ks[10], (Cmid,)),
        rnd(ks[11], (Cmid,)), 1.0 + jnp.abs(rnd(ks[12], (Cmid,))),
        # conv2 1x1 weight (Cmid, Cout), bias
        rnd(ks[13], (Cmid, Cout)), rnd(ks[14], (Cout,)),
        # bn2 (of ConvBlock conv2)
        1.0 + rnd(ks[15], (Cout,)), rnd(ks[16], (Cout,)),
        rnd(ks[17], (Cout,)), 1.0 + jnp.abs(rnd(ks[18], (Cout,))),
    )

    out = jax.block_until_ready(residual_bottleneck(x, params))
    assert out.shape == (N, Cout, H, W)

    ref = reference_forward(x, params)
    max_diff = float(jnp.max(jnp.abs(out - ref)))
    if not jnp.allclose(out, ref, atol=1e-3, rtol=1e-3):
        raise AssertionError(f"mismatch vs reference: max abs diff = {max_diff}")
    print("KERNEL_OK")
</pallas_src>

<mosaic_0001>
module attributes {stable_mosaic.version = 11 : i64} {
  func.func @_residual_bottleneck_kernel(%arg0: i32, %arg1: memref<1x4x256xf32, #tpu.memory_space<vmem>>, %arg2: memref<12x4xf32, #tpu.memory_space<vmem>>, %arg3: memref<12x1xf32, #tpu.memory_space<vmem>>, %arg4: memref<9x12x256xf32, #tpu.memory_space<vmem>>, %arg5: memref<12x1xf32, #tpu.memory_space<vmem>>, %arg6: memref<4x12xf32, #tpu.memory_space<vmem>>, %arg7: memref<4x1xf32, #tpu.memory_space<vmem>>, %arg8: memref<1x4x256xf32, #tpu.memory_space<vmem>>) attributes {dimension_semantics = [#tpu.dimension_semantics<parallel>], iteration_bounds = array<i64: 2>, scalar_prefetch = 0 : i64, scratch_operands = 0 : i64, tpu.core_type = #tpu.core_type<tc>, window_params = [{transform_indices = @transform_0, window_bounds = array<i64: 1, 4, 256>}, {pipeline_mode = #tpu.pipeline_mode<synchronous>, transform_indices = @transform_1, window_bounds = array<i64: 12, 4>}, {pipeline_mode = #tpu.pipeline_mode<synchronous>, transform_indices = @transform_2, window_bounds = array<i64: 12, 1>}, {pipeline_mode = #tpu.pipeline_mode<synchronous>, transform_indices = @transform_3, window_bounds = array<i64: 9, 12, 256>}, {pipeline_mode = #tpu.pipeline_mode<synchronous>, transform_indices = @transform_4, window_bounds = array<i64: 12, 1>}, {pipeline_mode = #tpu.pipeline_mode<synchronous>, transform_indices = @transform_5, window_bounds = array<i64: 4, 12>}, {pipeline_mode = #tpu.pipeline_mode<synchronous>, transform_indices = @transform_6, window_bounds = array<i64: 4, 1>}, {transform_indices = @transform_7, window_bounds = array<i64: 1, 4, 256>}]} {
    %c0 = arith.constant 0 : index
    %c0_0 = arith.constant 0 : index
    %0 = vector.load %arg2[%c0, %c0_0] : memref<12x4xf32, #tpu.memory_space<vmem>>, vector<12x4xf32>
    %c0_1 = arith.constant 0 : index
    %c0_2 = arith.constant 0 : index
    %c0_3 = arith.constant 0 : index
    %1 = vector.load %arg1[%c0_1, %c0_2, %c0_3] : memref<1x4x256xf32, #tpu.memory_space<vmem>>, vector<1x4x256xf32>
    %2 = vector.shape_cast %1 : vector<1x4x256xf32> to vector<4x256xf32>
    %cst = arith.constant dense<0.000000e+00> : vector<12x256xf32>
    %3 = tpu.matmul %0, %2, %cst {dimension_numbers = #tpu.dot_dimension_numbers<[1], [0], [0], [1], [0, 0, 1, 1], [], []>} : vector<12x4xf32>, vector<4x256xf32>, vector<12x256xf32> -> vector<12x256xf32>
    %c0_4 = arith.constant 0 : index
    %c0_5 = arith.constant 0 : index
    %4 = vector.load %arg3[%c0_4, %c0_5] : memref<12x1xf32, #tpu.memory_space<vmem>>, vector<12x1xf32>
    %5 = vector.broadcast %4 : vector<12x1xf32> to vector<12x256xf32>
    %6 = arith.addf %3, %5 : vector<12x256xf32>
    %cst_6 = arith.constant 0.000000e+00 : f32
    %7 = vector.broadcast %cst_6 : f32 to vector<12x256xf32>
    %8 = arith.maximumf %6, %7 : vector<12x256xf32>
    %c4 = arith.constant 4 : index
    %c0_7 = arith.constant 0 : index
    %c0_8 = arith.constant 0 : index
    %9 = vector.load %arg4[%c4, %c0_7, %c0_8] : memref<9x12x256xf32, #tpu.memory_space<vmem>>, vector<1x12x256xf32>
    %10 = vector.shape_cast %9 : vector<1x12x256xf32> to vector<12x256xf32>
    %11 = arith.mulf %8, %10 : vector<12x256xf32>
    %c17_i32 = arith.constant 17 : i32
    %12 = tpu.dynamic_rotate %8 by %c17_i32 dim 1 : vector<12x256xf32>, i32 -> vector<12x256xf32>
    %c0_9 = arith.constant 0 : index
    %c0_10 = arith.constant 0 : index
    %c0_11 = arith.constant 0 : index
    %13 = vector.load %arg4[%c0_9, %c0_10, %c0_11] : memref<9x12x256xf32, #tpu.memory_space<vmem>>, vector<1x12x256xf32>
    %14 = vector.shape_cast %13 : vector<1x12x256xf32> to vector<12x256xf32>
    %15 = arith.mulf %12, %14 : vector<12x256xf32>
    %16 = arith.addf %11, %15 : vector<12x256xf32>
    %c16_i32 = arith.constant 16 : i32
    %17 = tpu.dynamic_rotate %8 by %c16_i32 dim 1 : vector<12x256xf32>, i32 -> vector<12x256xf32>
    %c1 = arith.constant 1 : index
    %c0_12 = arith.constant 0 : index
    %c0_13 = arith.constant 0 : index
    %18 = vector.load %arg4[%c1, %c0_12, %c0_13] : memref<9x12x256xf32, #tpu.memory_space<vmem>>, vector<1x12x256xf32>
    %19 = vector.shape_cast %18 : vector<1x12x256xf32> to vector<12x256xf32>
    %20 = arith.mulf %17, %19 : vector<12x256xf32>
    %21 = arith.addf %16, %20 : vector<12x256xf32>
    %c15_i32 = arith.constant 15 : i32
    %22 = tpu.dynamic_rotate %8 by %c15_i32 dim 1 : vector<12x256xf32>, i32 -> vector<12x256xf32>
    %c2 = arith.constant 2 : index
    %c0_14 = arith.constant 0 : index
    %c0_15 = arith.constant 0 : index
    %23 = vector.load %arg4[%c2, %c0_14, %c0_15] : memref<9x12x256xf32, #tpu.memory_space<vmem>>, vector<1x12x256xf32>
    %24 = vector.shape_cast %23 : vector<1x12x256xf32> to vector<12x256xf32>
    %25 = arith.mulf %22, %24 : vector<12x256xf32>
    %26 = arith.addf %21, %25 : vector<12x256xf32>
    %c1_i32 = arith.constant 1 : i32
    %27 = tpu.dynamic_rotate %8 by %c1_i32 dim 1 : vector<12x256xf32>, i32 -> vector<12x256xf32>
    %c3 = arith.constant 3 : index
    %c0_16 = arith.constant 0 : index
    %c0_17 = arith.constant 0 : index
    %28 = vector.load %arg4[%c3, %c0_16, %c0_17] : memref<9x12x256xf32, #tpu.memory_space<vmem>>, vector<1x12x256xf32>
    %29 = vector.shape_cast %28 : vector<1x12x256xf32> to vector<12x256xf32>
    %30 = arith.mulf %27, %29 : vector<12x256xf32>
    %31 = arith.addf %26, %30 : vector<12x256xf32>
    %c255_i32 = arith.constant 255 : i32
    %32 = tpu.dynamic_rotate %8 by %c255_i32 dim 1 : vector<12x256xf32>, i32 -> vector<12x256xf32>
    %c5 = arith.constant 5 : index
    %c0_18 = arith.constant 0 : index
    %c0_19 = arith.constant 0 : index
    %33 = vector.load %arg4[%c5, %c0_18, %c0_19] : memref<9x12x256xf32, #tpu.memory_space<vmem>>, vector<1x12x256xf32>
    %34 = vector.shape_cast %33 : vector<1x12x256xf32> to vector<12x256xf32>
    %35 = arith.mulf %32, %34 : vector<12x256xf32>
    %36 = arith.addf %31, %35 : vector<12x256xf32>
    %c241_i32 = arith.constant 241 : i32
    %37 = tpu.dynamic_rotate %8 by %c241_i32 dim 1 : vector<12x256xf32>, i32 -> vector<12x256xf32>
    %c6 = arith.constant 6 : index
    %c0_20 = arith.constant 0 : index
    %c0_21 = arith.constant 0 : index
    %38 = vector.load %arg4[%c6, %c0_20, %c0_21] : memref<9x12x256xf32, #tpu.memory_space<vmem>>, vector<1x12x256xf32>
    %39 = vector.shape_cast %38 : vector<1x12x256xf32> to vector<12x256xf32>
    %40 = arith.mulf %37, %39 : vector<12x256xf32>
    %41 = arith.addf %36, %40 : vector<12x256xf32>
    %c240_i32 = arith.constant 240 : i32
    %42 = tpu.dynamic_rotate %8 by %c240_i32 dim 1 : vector<12x256xf32>, i32 -> vector<12x256xf32>
    %c7 = arith.constant 7 : index
    %c0_22 = arith.constant 0 : index
    %c0_23 = arith.constant 0 : index
    %43 = vector.load %arg4[%c7, %c0_22, %c0_23] : memref<9x12x256xf32, #tpu.memory_space<vmem>>, vector<1x12x256xf32>
    %44 = vector.shape_cast %43 : vector<1x12x256xf32> to vector<12x256xf32>
    %45 = arith.mulf %42, %44 : vector<12x256xf32>
    %46 = arith.addf %41, %45 : vector<12x256xf32>
    %c239_i32 = arith.constant 239 : i32
    %47 = tpu.dynamic_rotate %8 by %c239_i32 dim 1 : vector<12x256xf32>, i32 -> vector<12x256xf32>
    %c8 = arith.constant 8 : index
    %c0_24 = arith.constant 0 : index
    %c0_25 = arith.constant 0 : index
    %48 = vector.load %arg4[%c8, %c0_24, %c0_25] : memref<9x12x256xf32, #tpu.memory_space<vmem>>, vector<1x12x256xf32>
    %49 = vector.shape_cast %48 : vector<1x12x256xf32> to vector<12x256xf32>
    %50 = arith.mulf %47, %49 : vector<12x256xf32>
    %51 = arith.addf %46, %50 : vector<12x256xf32>
    %c0_26 = arith.constant 0 : index
    %c0_27 = arith.constant 0 : index
    %52 = vector.load %arg5[%c0_26, %c0_27] : memref<12x1xf32, #tpu.memory_space<vmem>>, vector<12x1xf32>
    %53 = vector.broadcast %52 : vector<12x1xf32> to vector<12x256xf32>
    %54 = arith.addf %51, %53 : vector<12x256xf32>
    %cst_28 = arith.constant 0.000000e+00 : f32
    %55 = vector.broadcast %cst_28 : f32 to vector<12x256xf32>
    %56 = arith.maximumf %54, %55 : vector<12x256xf32>
    %c0_29 = arith.constant 0 : index
    %c0_30 = arith.constant 0 : index
    %57 = vector.load %arg6[%c0_29, %c0_30] : memref<4x12xf32, #tpu.memory_space<vmem>>, vector<4x12xf32>
    %cst_31 = arith.constant dense<0.000000e+00> : vector<4x256xf32>
    %58 = tpu.matmul %57, %56, %cst_31 {dimension_numbers = #tpu.dot_dimension_numbers<[1], [0], [0], [1], [0, 0, 1, 1], [], []>} : vector<4x12xf32>, vector<12x256xf32>, vector<4x256xf32> -> vector<4x256xf32>
    %c0_32 = arith.constant 0 : index
    %c0_33 = arith.constant 0 : index
    %59 = vector.load %arg7[%c0_32, %c0_33] : memref<4x1xf32, #tpu.memory_space<vmem>>, vector<4x1xf32>
    %60 = vector.broadcast %59 : vector<4x1xf32> to vector<4x256xf32>
    %61 = arith.addf %58, %60 : vector<4x256xf32>
    %c0_34 = arith.constant 0 : index
    %c0_35 = arith.constant 0 : index
    %c0_36 = arith.constant 0 : index
    %62 = vector.load %arg8[%c0_34, %c0_35, %c0_36] : memref<1x4x256xf32, #tpu.memory_space<vmem>>, vector<1x4x256xf32>
    %63 = vector.shape_cast %62 : vector<1x4x256xf32> to vector<4x256xf32>
    %64 = vector.shape_cast %61 : vector<4x256xf32> to vector<1x4x256xf32>
    tpu.vector_store %arg8[%c0_34, %c0_35, %c0_36], %64 {strides = array<i32>} : memref<1x4x256xf32, #tpu.memory_space<vmem>>, vector<1x4x256xf32>,
    return
  }
  func.func @transform_0(%arg0: i32) -> (i32, i32, i32) {
    %c0_i32 = arith.constant 0 : i32
    %c0_i32_0 = arith.constant 0 : i32
    %c0_i32_1 = arith.constant 0 : i32
    return %arg0, %c0_i32, %c0_i32_0 : i32, i32, i32
  }
  func.func @transform_1(%arg0: i32) -> (i32, i32) {
    %c0_i32 = arith.constant 0 : i32
    %c0_i32_0 = arith.constant 0 : i32
    %c0_i32_1 = arith.constant 0 : i32
    return %c0_i32, %c0_i32_0 : i32, i32
  }
  func.func @transform_2(%arg0: i32) -> (i32, i32) {
    %c0_i32 = arith.constant 0 : i32
    %c0_i32_0 = arith.constant 0 : i32
    %c0_i32_1 = arith.constant 0 : i32
    return %c0_i32, %c0_i32_0 : i32, i32
  }
  func.func @transform_3(%arg0: i32) -> (i32, i32, i32) {
    %c0_i32 = arith.constant 0 : i32
    %c0_i32_0 = arith.constant 0 : i32
    %c0_i32_1 = arith.constant 0 : i32
    %c0_i32_2 = arith.constant 0 : i32
    return %c0_i32, %c0_i32_0, %c0_i32_1 : i32, i32, i32
  }
  func.func @transform_4(%arg0: i32) -> (i32, i32) {
    %c0_i32 = arith.constant 0 : i32
    %c0_i32_0 = arith.constant 0 : i32
    %c0_i32_1 = arith.constant 0 : i32
    return %c0_i32, %c0_i32_0 : i32, i32
  }
  func.func @transform_5(%arg0: i32) -> (i32, i32) {
    %c0_i32 = arith.constant 0 : i32
    %c0_i32_0 = arith.constant 0 : i32
    %c0_i32_1 = arith.constant 0 : i32
    return %c0_i32, %c0_i32_0 : i32, i32
  }
  func.func @transform_6(%arg0: i32) -> (i32, i32) {
    %c0_i32 = arith.constant 0 : i32
    %c0_i32_0 = arith.constant 0 : i32
    %c0_i32_1 = arith.constant 0 : i32
    return %c0_i32, %c0_i32_0 : i32, i32
  }
  func.func @transform_7(%arg0: i32) -> (i32, i32, i32) {
    %c0_i32 = arith.constant 0 : i32
    %c0_i32_0 = arith.constant 0 : i32
    %c0_i32_1 = arith.constant 0 : i32
    return %arg0, %c0_i32, %c0_i32_0 : i32, i32, i32
  }
}

</mosaic_0001>

<bundles_post_ra>
// kernel: tpu_custom_call.1
= control target key start
LH: loop header
LB: loop body
LE: loop exit
PB: predicated region body
PF: predicated region fallthrough
CT: control target
= control target key end

     0   :  { %12 = vsyncpa [#allocation3], 0  ;;  %s1360_s0 = inlined_call_operand.vmem [shape: f32[2,4,256], index: 0, kind: input, shape index: {}]   ;;  %s1361_s1 = inlined_call_operand.vmem [shape: f32[12,4], index: 1, kind: input, shape index: {}]   ;;  %s1362_s2 = inlined_call_operand.vmem [shape: f32[12,1], index: 2, kind: input, shape index: {}]   ;;  %s1363_s3 = inlined_call_operand.hbm [shape: f32[9,12,256], index: 3, kind: input, shape index: {}]   ;;  %s1364_s4 = inlined_call_operand.vmem [shape: f32[12,1], index: 4, kind: input, shape index: {}]   ;;  %s1365_s5 = inlined_call_operand.vmem [shape: f32[4,12], index: 5, kind: input, shape index: {}]   ;;  %s1366_s6 = inlined_call_operand.vmem [shape: f32[4,1], index: 6, kind: input, shape index: {}]   ;;  %s1367_s7 = inlined_call_operand.hbm [shape: f32[2,4,256], index: 7, kind: output, shape index: {}]  }
   0x1   :  { %13 = vsyncpa [#allocation4], 0 }
   0x2   :  { %15 = vsyncpa [#allocation4 + $0x1], 0  ;;  %s1053_s24 = smov 0   ;;  %s1055_s25 = smov 0  }
   0x3   :  { %s1057_s26 = smov 0   ;;  %s1059_s27 = smov 0  }
   0x4 LB: > { %s1074_s28 = sadd.s32 4294967295, %s997_s27   ;;  %s819_s29 = sadd.s32 4294967294, %s997_s27   ;;  %s997_s27 = sphi %s1059_s27, %s1375_s27   ;;  %s993_s26 = sphi %s1057_s26, %s1374_s26   ;;  %s989_s25 = sphi %s1055_s25, %s1373_s25   ;;  %s985_s24 = sphi %s1053_s24, %s1372_s24  }
   0x5   : > { %s1078_s30 = sadd.s32 1, %s997_s27   ;;  %s180_s8 = sadd.s32 1, %s993_s26 }
   0x6   : > { %s177_s9 = ssub.s32 %s997_s27, %s1078_s30  ;;  %p190_p0 = scmp.ne.s32.totalorder %s993_s26, %s989_s25 }
   0x7   : > { %p178_p1 = scmp.eq.s32.totalorder %s177_s9, 0  ;;  %p191_p2 = scmp.eq.s32.totalorder %s1074_s28, 1 }
   0x8   : > { %p196_p3 = scmp.ne.s32.totalorder %s989_s25, %s985_s24  ;;  %p197_p4 = scmp.eq.s32.totalorder %s819_s29, 1 }
   0x9   : > { %s1089_s10 = scalar_select %p178_p1, %s993_s26, %s180_s8  }
   0xa   : > { %p1091_p5 = por %p191_p2, %p190_p0  ;;  %p1095_p6 = por %p197_p4, %p196_p3 }
   0xb   : > { %p820_p7 = scmp.ge.s32.totalorder %s997_s27, 1  ;;  %p204_p8 = scmp.lt.s32.totalorder %s997_s27, 3 }
   0xc   : > { %s1369_s12 = scalar_select %p1095_p6, 1, 0 }
   0xd   : > { %p856_p9 = scmp.eq.s32.totalorder %s1074_s28, 0  ;;  %p1102_p10 = pnand %p820_p7, %p204_p8 }
   0xe   : > { %s999_s14 = smov [#allocation2]  }
   0xf   : > { %s222_s15 = sshll.u32 %s999_s14, 4  ;;  %p848_p11 = pneg %p1102_p10  ;;  %s223_s15 = int_to_ptr.vmem [resolvable:$true] %s222_s15 }
  0x10   : > { %s918_s16 = scalar_lea.vmem %s223_s15, 4608  ;;  %p926_p3 = scmp.lt.s32.totalorder %s223_s15, %s223_s15 }
  0x11   : > { %p849_p12 = pnand %p856_p9, %p848_p11  ;;  %p919_p0 = scmp.ne.s32.totalorder %s223_s15, %s918_s16 }
  0x12   : > { %p927_p4 = scmp.lt.s32.totalorder %s918_s16, %s918_s16 }
  0x13   : > { %p909_p13 = pneg %p849_p12 }
  0x14   : > { %p928_p6 = por %p927_p4, %p926_p3 }
  0x15   : > { %p921_p1 = pnand %p919_p0, %p909_p13 }
  0x17   : > { %p922_p2 = pneg %p921_p1 }
  0x19   : > { %p929_p7 = pnand %p928_p6, %p922_p2 }
  0x1b   : > { %932 = shalt.err (!%p929_p7)
}
  0x1c   : > { %s1000_s17 = smov 256   ;;  %s1001_s18 = smov 16  }
  0x1d   : > { %851 = dma.hbm_to_vmem [thread:$0]  (!%p849_p12), %s1363_s3, 4608, %s223_s15, [#allocation3], %s1000_s17, %s1000_s17, %s1001_s18  }
  0x1e   : > { %255 = sbr.rel (%p1102_p10) target bundleno = 654 (0x28e), region = 48 }
  0x23   : > { %976 = dma.done.wait (%p856_p9), [#allocation3], 4608  }
  0x24   : > { %978 = vsyncadd (%p856_p9), [#allocation3], 4294962688  ;;  %p287_p8 = scmp.lt.s32.totalorder %s1074_s28, 1  ;;  %v1002_v0 = vmov 0.0   ;;  %v1003_v1 = vmov 0   ;;  %vm316_vm0 = vcmask 1043456   ;;  %v419_v38 = vlaneseq }
  0x25   : > { %385 = vmatprep.mubr.f32.mxu0 %v1002_v0  ;;  %721 = vmatprep.mubr.f32.mxu1 %v1002_v0  ;;  %v296_v4 = vld [vmem:[%s1362_s2 + $0x8] sm:$0xf]  ;;  %v292_v5 = vld [vmem:[%s1361_s1] sm:$0xff]  ;;  %vm309_vm1 = vcmask 31744   ;;  %s1005_s23 = smov 17   ;;  %s1006_s29 = smov 16  }
  0x26   : > { %s288_s21 = scalar_select %p287_p8, %s1074_s28, 1  ;;  %904 = vset.pattern.permute.xlu0 %v1003_v1  ;;  %905 = vset.pattern.permute.xlu1 %v1003_v1  ;;  %v295_v6 = vld [vmem:[%s1362_s2] sm:$0xff]  ;;  %v293_v7 = vld [vmem:[%s1361_s1 + $0x8] sm:$0xf]  ;;  %v1205_v41 = vand.u32 127, %v419_v38  ;;  %vm647_vm10 = vcmask 97280  }
  0x27   : > { %304 = vperm.xlu0 %904, %v296_v4   ;;  %v621_v8 = vld [vmem:[%s1364_s4 + $0x8] sm:$0xf]  ;;  %s1008_s9 = smov 1   ;;  %s1009_s13 = smov 127   ;;  %v641_v23 = vld [vmem:[%s1366_s6] sm:$0xf] }
  0x28   : > { %s840_s22 = sshll.u32 %s288_s21, 3  ;;  %s1010_s14 = smov 113   ;;  %v620_v24 = vld [vmem:[%s1364_s4] sm:$0xff]  ;;  %vm421_vm2 = vcmp.lt.s32.totalorder %v1205_v41, 17  ;;  %vm446_vm3 = vcmp.lt.s32.totalorder %v1205_v41, 16  ;;  %v427_v45 = vld [vmem:[#allocation2 + $0x8] sm:$0xff] }
  0x29   : > { %s291_s8 = scalar_lea.vmem %s1360_s0, %s840_s22  ;;  %s1004_s22 = smov 111   ;;  %v426_v44 = vld [vmem:[#allocation2] sm:$0xff]  ;;  %v404_v51 = vld [vmem:[#allocation2 + $0x88] sm:$0xff]  ;;  %vm472_vm4 = vcmp.lt.s32.totalorder %v1205_v41, 15  ;;  %vm498_vm5 = vcmp.lt.s32.totalorder %v1205_v41, 1  ;;  %vm524_vm6 = vcmp.lt.s32.totalorder %v1205_v41, 127 }
  0x2a   : > { %v294_v2 = vld [vmem:[%s291_s8] sm:$0xff]  ;;  %s1007_s8 = smov 15   ;;  %s1011_s15 = smov 112   ;;  %v453_v53 = vld [vmem:[#allocation2 + $0x28] sm:$0xff]  ;;  %vm550_vm7 = vcmp.lt.s32.totalorder %v1205_v41, 113  ;;  %vm576_vm8 = vcmp.lt.s32.totalorder %v1205_v41, 112 }
  0x2b   : > { %v308_v3 = vcombine.high %v294_v2, %v294_v2  ;;  %299 = vperm.xlu0 %904, %v295_v6   ;;  %v403_v50 = vld [vmem:[#allocation2 + $0x80] sm:$0xff]  ;;  %v479_v1 = vld [vmem:[#allocation2 + $0x48] sm:$0xff]  ;;  %vm602_vm9 = vcmp.lt.s32.totalorder %v1205_v41, 111  ;;  %s1012_s18 = smov [#allocation5]  }
  0x2c   : > { %v452_v52 = vld [vmem:[#allocation2 + $0x20] sm:$0xff]  ;;  %s937_s19 = sshll.u32 %s1012_s18, 4  ;;  %s938_s19 = int_to_ptr.vmem [resolvable:$false] %s937_s19 }
  0x2d   : > { %828 = vmatprep.subr.msk.mxu0 %vm316_vm0, %v308_v3  ;;  %v504_v6 = vld [vmem:[#allocation2 + $0x60] sm:$0xff] }
  0x2e   : > { %829 = vmatpush1.msk.msra.mxu0 %vm316_vm0, %v294_v2 }
  0x2f   : > { %830 = vmatmul.mubr.msk.f32.vlgmr.msra.gmra.mxu0 %vm309_vm1, %v292_v5  ;;  %629 = vperm.xlu0 %904, %v621_v8  }
  0x30   : > { %391 = vmatprep.mubr.f32.mxu0 %v1002_v0  ;;  %v478_v0 = vld [vmem:[#allocation2 + $0x40] sm:$0xff] }
  0x33   : > { %831 = vmatmul.mubr.msk.f32.gmra.mxu0 %vm309_vm1, %v293_v7  ;;  %v505_v7 = vld [vmem:[#allocation2 + $0x68] sm:$0xff] }
  0xa2   : > { %v305_v9 = vpop.permute.xlu0 %304 }
  0xa6   : > { %v300_v10 = vpop.permute.xlu0 %299 }
  0xaa   : > { %v1195_v25 = vpop.permute.xlu0 %629 }
  0xef   : > { %v387_v11 = vpop.f32.mrf.mxu0 }
  0xf0   : > { %v388_v12 = vadd.f32 %v387_v11, %v300_v10 }
  0xf1   : > { %v389_v13 = vpop.f32.mrf.mxu0 }
  0xf2   : > { %v1141_v14 = vmax.f32 %v388_v12, 0.0  ;;  %v390_v15 = vadd.f32 %v389_v13, %v300_v10 }
  0xf3   : > { %v393_v17 = vpop.f32.mrf.mxu0 }
  0xf4   : > { %594 = vrot.lane.b32.xlu1 %v1141_v14, %s1004_s22  ;;  %411 = vrot.lane.b32.xlu0 %v1141_v14, %s1005_s23  ;;  %v1147_v16 = vmax.f32 %v390_v15, 0.0  ;;  %v394_v18 = vadd.f32 %v393_v17, %v305_v9  ;;  %v407_v59 = vmul.f32 %v403_v50, %v1141_v14  ;;  %v557_v50 = vld [vmem:[#allocation2 + $0xc8] sm:$0xff] }
  0xf5   : > { %v395_v20 = vpop.f32.mrf.mxu0 }
  0xf6   : > { %v1162_v19 = vmax.f32 %v394_v18, 0.0  ;;  %v396_v21 = vadd.f32 %v395_v20, %v305_v9  ;;  %v408_v58 = vmul.f32 %v404_v51, %v1147_v16  ;;  %v530_v18 = vld [vmem:[#allocation2 + $0xa0] sm:$0xff]  ;;  %v531_v20 = vld [vmem:[#allocation2 + $0xa8] sm:$0xff] }
  0xf8   : > { %415 = vrot.lane.b32.xlu1 %v1147_v16, %s1005_s23  ;;  %438 = vrot.lane.b32.xlu0 %v1141_v14, %s1006_s29  ;;  %v1169_v22 = vmax.f32 %v396_v21, 0.0 }
  0xfc   : > { %442 = vrot.lane.b32.xlu1 %v1147_v16, %s1006_s29  ;;  %464 = vrot.lane.b32.xlu0 %v1141_v14, %s1007_s8 }
 0x100   : > { %468 = vrot.lane.b32.xlu1 %v1147_v16, %s1007_s8  ;;  %490 = vrot.lane.b32.xlu0 %v1141_v14, %s1008_s9 }
 0x104   : > { %494 = vrot.lane.b32.xlu1 %v1147_v16, %s1008_s9  ;;  %516 = vrot.lane.b32.xlu0 %v1141_v14, %s1009_s13 }
 0x108   : > { %520 = vrot.lane.b32.xlu1 %v1147_v16, %s1009_s13  ;;  %542 = vrot.lane.b32.xlu0 %v1141_v14, %s1010_s14 }
 0x10c   : > { %546 = vrot.lane.b32.xlu1 %v1147_v16, %s1010_s14  ;;  %568 = vrot.lane.b32.xlu0 %v1141_v14, %s1011_s15 }
 0x110   : > { %572 = vrot.lane.b32.xlu1 %v1147_v16, %s1011_s15  ;;  %440 = vrot.lane.b32.xlu0 %v1162_v19, %s1006_s29 }
 0x114   : > { %413 = vrot.lane.b32.xlu1 %v1162_v19, %s1005_s23  ;;  %466 = vrot.lane.b32.xlu0 %v1162_v19, %s1007_s8 }
 0x118   : > { %417 = vrot.lane.b32.xlu1 %v1169_v22, %s1005_s23  ;;  %492 = vrot.lane.b32.xlu0 %v1162_v19, %s1008_s9 }
 0x11c   : > { %444 = vrot.lane.b32.xlu1 %v1169_v22, %s1006_s29  ;;  %518 = vrot.lane.b32.xlu0 %v1162_v19, %s1009_s13  ;;  %s841_s29 = sshll.u32 %s1074_s28, 7  ;;  %s939_s28 = scalar_lea.vmem %s938_s19, 256 }
 0x120   : > { %470 = vrot.lane.b32.xlu1 %v1169_v22, %s1007_s8  ;;  %544 = vrot.lane.b32.xlu0 %v1162_v19, %s1010_s14 }
 0x124   : > { %496 = vrot.lane.b32.xlu1 %v1169_v22, %s1008_s9  ;;  %570 = vrot.lane.b32.xlu0 %v1162_v19, %s1011_s15 }
 0x128   : > { %522 = vrot.lane.b32.xlu1 %v1169_v22, %s1009_s13  ;;  %596 = vrot.lane.b32.xlu0 %v1162_v19, %s1004_s22 }
 0x12c   : > { %548 = vrot.lane.b32.xlu1 %v1169_v22, %s1010_s14  ;;  %598 = vrot.lane.b32.xlu0 %v1147_v16, %s1004_s22 }
 0x130   : > { %574 = vrot.lane.b32.xlu1 %v1169_v22, %s1011_s15  ;;  %644 = vperm.xlu0 %904, %v641_v23   ;;  %s746_s15 = scalar_lea.hbm %s1367_s7, %s841_s29 }
 0x134   : > { %600 = vrot.lane.b32.xlu1 %v1169_v22, %s1004_s22  ;;  %s284_s22 = sand.u32 1, %s989_s25  }
 0x135   : > { %s825_s23 = sshll.u32 %s284_s22, 3  ;;  %s734_s16 = scalar_lea.sflag [#allocation4], %s284_s22 }
 0x136   : > { %s286_s8 = scalar_lea.vmem [#allocation5], %s825_s23 }
 0x137   : > { %s748_s9 = sshll.u32 %s286_s8, 4  ;;  %s749_s9 = int_to_ptr.vmem [resolvable:$true] %s748_s9 }
 0x138   : > { %624 = vperm.xlu1 %905, %v620_v24   ;;  %s933_s17 = scalar_lea.vmem %s749_s9, 128  ;;  %p940_p11 = scmp.lt.s32.totalorder %s749_s9, %s938_s19 }
 0x139   : > { %p934_p6 = scmp.ne.s32.totalorder %s749_s9, %s933_s17  ;;  %p941_p12 = scmp.lt.s32.totalorder %s939_s28, %s933_s17 }
 0x13b   : > { %p935_p9 = pnand %p934_p6, %p1091_p5  ;;  %p942_p13 = por %p941_p12, %p940_p11 }
 0x13d   : > { %p936_p10 = pneg %p935_p9 }
 0x13f   : > { %p943_p0 = pnand %p942_p13, %p936_p10 }
 0x166   : > { %v1197_v26 = vpop.permute.xlu1 %594  ;;  %v412_v27 = vpop.permute.xlu0 %411 }
 0x16a   : > { %v416_v28 = vpop.permute.xlu1 %415  ;;  %v439_v29 = vpop.permute.xlu0 %438 }
 0x16b   : > { %v422_v46 = vsel %vm421_vm2, %v412_v27, %v416_v28  ;;  %v424_v47 = vsel %vm421_vm2, %v416_v28, %v412_v27  ;;  %v428_v28 = vld [vmem:[#allocation2 + $0x10] sm:$0xf] }
 0x16c   : > { %v430_v56 = vmul.f32 %v426_v44, %v424_v47  ;;  %v431_v57 = vmul.f32 %v427_v45, %v422_v46  ;;  %v556_v46 = vld [vmem:[#allocation2 + $0xc0] sm:$0xff] }
 0x16e   : > { %v443_v30 = vpop.permute.xlu1 %442  ;;  %v465_v31 = vpop.permute.xlu0 %464  ;;  %v434_v4 = vadd.f32 %v430_v56, %v407_v59  ;;  %v435_v5 = vadd.f32 %v431_v57, %v408_v58  ;;  %v582_v57 = vld [vmem:[#allocation2 + $0xe0] sm:$0xff]  ;;  %v583_v58 = vld [vmem:[#allocation2 + $0xe8] sm:$0xff] }
 0x16f   : > { %v447_v54 = vsel %vm446_vm3, %v439_v29, %v443_v30  ;;  %v449_v55 = vsel %vm446_vm3, %v443_v30, %v439_v29  ;;  %v429_v29 = vld [vmem:[#allocation2 + $0x18] sm:$0xf] }
 0x170   : > { %v456_v62 = vmul.f32 %v452_v52, %v449_v55  ;;  %v457_v63 = vmul.f32 %v453_v53, %v447_v54  ;;  %v454_v53 = vld [vmem:[#allocation2 + $0x30] sm:$0xf]  ;;  %v455_v54 = vld [vmem:[#allocation2 + $0x38] sm:$0xf] }
 0x172   : > { %v469_v32 = vpop.permute.xlu1 %468  ;;  %v491_v33 = vpop.permute.xlu0 %490  ;;  %v460_v14 = vadd.f32 %v456_v62, %v434_v4  ;;  %v461_v15 = vadd.f32 %v457_v63, %v435_v5 }
 0x173   : > { %v473_v2 = vsel %vm472_vm4, %v465_v31, %v469_v32  ;;  %v475_v3 = vsel %vm472_vm4, %v469_v32, %v465_v31 }
 0x174   : > { %v482_v10 = vmul.f32 %v478_v0, %v475_v3  ;;  %v483_v11 = vmul.f32 %v479_v1, %v473_v2  ;;  %v480_v1 = vld [vmem:[#allocation2 + $0x50] sm:$0xf]  ;;  %v481_v2 = vld [vmem:[#allocation2 + $0x58] sm:$0xf] }
 0x176   : > { %v495_v34 = vpop.permute.xlu1 %494  ;;  %v517_v35 = vpop.permute.xlu0 %516  ;;  %v486_v24 = vadd.f32 %v482_v10, %v460_v14  ;;  %v487_v27 = vadd.f32 %v483_v11, %v461_v15  ;;  %v506_v11 = vld [vmem:[#allocation2 + $0x70] sm:$0xf] }
 0x177   : > { %v499_v8 = vsel %vm498_vm5, %v491_v33, %v495_v34  ;;  %v501_v9 = vsel %vm498_vm5, %v495_v34, %v491_v33 }
 0x178   : > { %v508_v16 = vmul.f32 %v504_v6, %v501_v9  ;;  %v509_v17 = vmul.f32 %v505_v7, %v499_v8 }
 0x17a   : > { %v521_v36 = vpop.permute.xlu1 %520  ;;  %v1199_v37 = vpop.permute.xlu0 %542  ;;  %v512_v44 = vadd.f32 %v508_v16, %v486_v24  ;;  %v513_v45 = vadd.f32 %v509_v17, %v487_v27 }
 0x17b   : > { %v525_v21 = vsel %vm524_vm6, %v517_v35, %v521_v36  ;;  %v527_v23 = vsel %vm524_vm6, %v521_v36, %v517_v35  ;;  %v405_v35 = vld [vmem:[#allocation2 + $0x90] sm:$0xf]  ;;  %v406_v36 = vld [vmem:[#allocation2 + $0x98] sm:$0xf] }
 0x17c   : > { %v534_v34 = vmul.f32 %v530_v18, %v525_v21  ;;  %v535_v38 = vmul.f32 %v531_v20, %v527_v23  ;;  %v409_v59 = vmul.f32 %v405_v35, %v1162_v19  ;;  %v532_v23 = vld [vmem:[#allocation2 + $0xb0] sm:$0xf] }
 0x17e   : > { %v1201_v39 = vpop.permute.xlu1 %546  ;;  %v1203_v40 = vpop.permute.xlu0 %568  ;;  %v539_v0 = vadd.f32 %v535_v38, %v513_v45  ;;  %v558_v45 = vld [vmem:[#allocation2 + $0xd0] sm:$0xf] }
 0x17f   : > { %v551_v47 = vsel %vm550_vm7, %v1199_v37, %v1201_v39 }
 0x182   : > { %v1207_v42 = vpop.permute.xlu1 %572  ;;  %v1209_v43 = vpop.permute.xlu0 %440 }
 0x186   : > { %v414_v48 = vpop.permute.xlu1 %413  ;;  %v1217_v49 = vpop.permute.xlu0 %466 }
 0x18a   : > { %v418_v60 = vpop.permute.xlu1 %417  ;;  %v1227_v61 = vpop.permute.xlu0 %492 }
 0x18b   : > { %v423_v30 = vsel %vm421_vm2, %v414_v48, %v418_v60  ;;  %v425_v31 = vsel %vm421_vm2, %v418_v60, %v414_v48  ;;  %v553_v48 = vsel %vm550_vm7, %v1201_v39, %v1199_v37  ;;  %v577_v37 = vsel %vm576_vm8, %v1203_v40, %v1207_v42 }
 0x18c   : > { %v432_v51 = vmul.f32 %v428_v28, %v425_v31  ;;  %v433_v52 = vmul.f32 %v429_v29, %v423_v30  ;;  %v579_v39 = vsel %vm576_vm8, %v1207_v42, %v1203_v40  ;;  %v410_v60 = vmul.f32 %v406_v36, %v1169_v22  ;;  %v533_v28 = vld [vmem:[#allocation2 + $0xb8] sm:$0xf]  ;;  %v608_v30 = vld [vmem:[#allocation2 + $0x100] sm:$0xff]  ;;  %v609_v31 = vld [vmem:[#allocation2 + $0x108] sm:$0xff] }
 0x18d   : > { %v560_v40 = vmul.f32 %v556_v46, %v551_v47  ;;  %v561_v42 = vmul.f32 %v557_v50, %v553_v48  ;;  %v586_v22 = vmul.f32 %v582_v57, %v577_v37  ;;  %v587_v6 = vmul.f32 %v583_v58, %v579_v39  ;;  %v559_v46 = vld [vmem:[#allocation2 + $0xd8] sm:$0xf]  ;;  %v584_v57 = vld [vmem:[#allocation2 + $0xf0] sm:$0xf] }
 0x18e   : > { %v445_v12 = vpop.permute.xlu1 %444  ;;  %v1238_v13 = vpop.permute.xlu0 %518  ;;  %v436_v7 = vadd.f32 %v432_v51, %v409_v59  ;;  %v437_v8 = vadd.f32 %v433_v52, %v410_v60  ;;  %v585_v58 = vld [vmem:[#allocation2 + $0xf8] sm:$0xf] }
 0x18f   : > { %v448_v55 = vsel %vm446_vm3, %v1209_v43, %v445_v12  ;;  %v450_v56 = vsel %vm446_vm3, %v445_v12, %v1209_v43  ;;  %v538_v43 = vadd.f32 %v534_v34, %v512_v44  ;;  %v507_v12 = vld [vmem:[#allocation2 + $0x78] sm:$0xf]  ;;  %v565_v18 = vadd.f32 %v561_v42, %v539_v0 }
 0x190   : > { %v458_v19 = vmul.f32 %v454_v53, %v450_v56  ;;  %v459_v5 = vmul.f32 %v455_v54, %v448_v55 }
 0x191   : > { %v564_v17 = vadd.f32 %v560_v40, %v538_v43  ;;  %v591_v44 = vadd.f32 %v587_v6, %v565_v18 }
 0x192   : > { %v471_v32 = vpop.permute.xlu1 %470  ;;  %v1249_v33 = vpop.permute.xlu0 %544  ;;  %v462_v20 = vadd.f32 %v458_v19, %v436_v7  ;;  %v463_v21 = vadd.f32 %v459_v5, %v437_v8 }
 0x193   : > { %v474_v3 = vsel %vm472_vm4, %v1217_v49, %v471_v32  ;;  %v476_v4 = vsel %vm472_vm4, %v471_v32, %v1217_v49  ;;  %v590_v36 = vadd.f32 %v586_v22, %v564_v17 }
 0x194   : > { %v484_v9 = vmul.f32 %v480_v1, %v476_v4  ;;  %v485_v10 = vmul.f32 %v481_v2, %v474_v3  ;;  %v610_v3 = vld [vmem:[#allocation2 + $0x110] sm:$0xf]  ;;  %v611_v4 = vld [vmem:[#allocation2 + $0x118] sm:$0xf] }
 0x196   : > { %v497_v62 = vpop.permute.xlu1 %496  ;;  %v1276_v63 = vpop.permute.xlu0 %570  ;;  %v488_v32 = vadd.f32 %v484_v9, %v462_v20  ;;  %v489_v34 = vadd.f32 %v485_v10, %v463_v21  ;;  %v640_v20 = vld [vmem:[%s1365_s5] sm:$0xf] }
 0x197   : > { %v500_v14 = vsel %vm498_vm5, %v1227_v61, %v497_v62  ;;  %v502_v49 = vsel %vm498_vm5, %v497_v62, %v1227_v61 }
 0x198   : > { %v510_v24 = vmul.f32 %v506_v11, %v502_v49  ;;  %v511_v27 = vmul.f32 %v507_v12, %v500_v14 }
 0x19a   : > { %v523_v15 = vpop.permute.xlu1 %522  ;;  %v597_v16 = vpop.permute.xlu0 %596  ;;  %v514_v55 = vadd.f32 %v510_v24, %v488_v32  ;;  %v515_v56 = vadd.f32 %v511_v27, %v489_v34 }
 0x19b   : > { %v526_v29 = vsel %vm524_vm6, %v1238_v13, %v523_v15  ;;  %v528_v61 = vsel %vm524_vm6, %v523_v15, %v1238_v13 }
 0x19c   : > { %v536_v51 = vmul.f32 %v532_v23, %v526_v29  ;;  %v537_v52 = vmul.f32 %v533_v28, %v528_v61 }
 0x19e   : > { %v549_v38 = vpop.permute.xlu1 %548  ;;  %v599_v35 = vpop.permute.xlu0 %598  ;;  %v540_v43 = vadd.f32 %v536_v51, %v514_v55  ;;  %v541_v0 = vadd.f32 %v537_v52, %v515_v56 }
 0x19f   : > { %v552_v47 = vsel %vm550_vm7, %v1249_v33, %v549_v38  ;;  %v554_v48 = vsel %vm550_vm7, %v549_v38, %v1249_v33  ;;  %v603_v13 = vsel %vm602_vm9, %v1197_v26, %v599_v35  ;;  %v605_v50 = vsel %vm602_vm9, %v599_v35, %v1197_v26 }
 0x1a0   : > { %v612_v53 = vmul.f32 %v608_v30, %v603_v13  ;;  %v613_v54 = vmul.f32 %v609_v31, %v605_v50  ;;  %v562_v37 = vmul.f32 %v558_v45, %v552_v47  ;;  %v563_v39 = vmul.f32 %v559_v46, %v554_v48 }
 0x1a2   : > { %v575_v59 = vpop.permute.xlu1 %574  ;;  %v616_v33 = vadd.f32 %v612_v53, %v590_v36  ;;  %v617_v60 = vadd.f32 %v613_v54, %v591_v44  ;;  %v566_v40 = vadd.f32 %v562_v37, %v540_v43  ;;  %v567_v42 = vadd.f32 %v563_v39, %v541_v0 }
 0x1a3   : > { %v578_v62 = vsel %vm576_vm8, %v1276_v63, %v575_v59  ;;  %v580_v26 = vsel %vm576_vm8, %v575_v59, %v1276_v63 }
 0x1a4   : > { %v588_v1 = vmul.f32 %v584_v57, %v578_v62  ;;  %v589_v2 = vmul.f32 %v585_v58, %v580_v26 }
 0x1a6   : > { %v601_v19 = vpop.permute.xlu1 %600  ;;  %v592_v6 = vadd.f32 %v588_v1, %v566_v40  ;;  %v593_v7 = vadd.f32 %v589_v2, %v567_v42 }
 0x1a7   : > { %v604_v5 = vsel %vm602_vm9, %v597_v16, %v601_v19  ;;  %v606_v22 = vsel %vm602_vm9, %v601_v19, %v597_v16 }
 0x1a8   : > { %v614_v8 = vmul.f32 %v610_v3, %v604_v5  ;;  %v615_v9 = vmul.f32 %v611_v4, %v606_v22 }
 0x1aa   : > { %v618_v63 = vadd.f32 %v614_v8, %v592_v6  ;;  %v619_v10 = vadd.f32 %v615_v9, %v593_v7 }
 0x1ab   : > { %v645_v21 = vpop.permute.xlu0 %644 }
 0x1ac   : > { %v635_v11 = vadd.f32 %v1195_v25, %v619_v10  ;;  %v634_v12 = vadd.f32 %v1195_v25, %v618_v63 }
 0x1ae   : > { %v639_v14 = vmax.f32 %v635_v11, 0.0  ;;  %v638_v49 = vmax.f32 %v634_v12, 0.0 }
 0x1b0   : > { %832 = vmatprep.subr.msk.mxu1 %vm316_vm0, %v639_v14 }
 0x1b1   : > { %833 = vmatpush1.msk.msra.mxu1 %vm316_vm0, %v638_v49 }
 0x1b3   : > { %v625_v41 = vpop.permute.xlu1 %624 }
 0x1b4   : > { %v632_v15 = vadd.f32 %v625_v41, %v616_v33  ;;  %v633_v16 = vadd.f32 %v625_v41, %v617_v60 }
 0x1b6   : > { %v636_v17 = vmax.f32 %v632_v15, 0.0  ;;  %v637_v18 = vmax.f32 %v633_v16, 0.0 }
 0x1b8   : > { %687 = vmatprep.subr.mxu1 %v637_v18 }
 0x1b9   : > { %688 = vmatpush1.msra.mxu1 %v636_v17 }
 0x1ba   : > { %834 = vmatmul.mubr.msk.f32.vlgmr.msra.gmra.mxu1 %vm647_vm10, %v640_v20 }
 0x27a   : > { %v723_v25 = vpop.f32.mrf.mxu1 }
 0x27b   : > { %v724_v24 = vadd.f32 %v723_v25, %v645_v21 }
 0x27c   : > { %v725_v23 = vpop.f32.mrf.mxu1 }
 0x27d   : > { %v726_v27 = vadd.f32 %v725_v23, %v645_v21 }
 0x27f   : > { %v730_v28 = vcombine.low %v724_v24, %v726_v27 }
 0x281   : > { %732 = vst [vmem:[%s286_s8] sm:$0xff] %v730_v28 }
 0x282   : > { %946 = shalt.err (!%p943_p0)
}
 0x283   : > { %s947_s20 = scalar_lea.hbm %s746_s15, 128  ;;  %s951_s23 = scalar_lea.hbm %s1367_s7, 256 }
 0x284   : > { %p948_p1 = scmp.ne.s32.totalorder %s746_s15, %s947_s20  ;;  %p952_p4 = scmp.lt.s32.totalorder %s746_s15, %s1367_s7 }
 0x285   : > { %p953_p7 = scmp.lt.s32.totalorder %s951_s23, %s947_s20 }
 0x286   : > { %p949_p2 = pnand %p948_p1, %p1091_p5 }
 0x287   : > { %p954_p8 = por %p953_p7, %p952_p4 }
 0x288   : > { %p950_p3 = pneg %p949_p2 }
 0x28a   : > { %p955_p6 = pnand %p954_p8, %p950_p3 }
 0x28c   : > { %958 = shalt.err (!%p955_p6)
}
 0x28d   : > { %846 = dma.vmem_to_hbm [thread:$0]  (%p1091_p5), %s749_s9, 128, %s746_s15, %s734_s16  }
 0x28e PF: > { %p858_p9 = scmp.ge.s32.totalorder %s997_s27, 2  ;;  %s760_s13 = sand.u32 1, %s985_s24  }
 0x28f   : > { %p1371_p10 = scmp.ne.s32.totalorder %s1369_s12, 0  ;;  %s761_s14 = scalar_lea.sflag [#allocation4], %s760_s13 }
 0x291   : > { %p853_p11 = pnand %p858_p9, %p1371_p10 }
 0x293   : > { %p854_p12 = pneg %p853_p11 }
 0x295   : > { %980 = dma.done.wait (%p854_p12), %s761_s14, 128  }
 0x296   : > { %982 = vsyncadd (%p854_p12), %s761_s14, 4294967168  ;;  %p18_p13 = scmp.ge.s32.totalorder %s1078_s30, 4   ;;  %s1372_s24 = smov %s989_s25 }
 0x297   : > { %s1373_s25 = smov %s993_s26  ;;  %s1374_s26 = smov %s1089_s10 }
 0x298   : > { %s1375_s27 = smov %s1078_s30  ;;  %20 = sbr.rel (!%p18_p13) target bundleno = 4 (0x4), region = 96 }
 0x29d   :  { %766 = vsyncpa [#allocation3], 1 }
 0x29e   :  { %768 = vsyncpa [#allocation3 + $0x1], 1 }
 0x29f   :  { %769 = vsyncpa [#allocation4], 1 }
 0x2a0   :  { %771 = vsyncpa [#allocation4 + $0x1], 1 }

</bundles_post_ra>
